<compile_context>
chip_gen: v7x
topology: tpu7x:2x2x1
jax: 0.10.0
libtpu: 0.0.40
codegen_flags: <defaults>
</compile_context>

<pallas_src>
import functools

import jax
import jax.numpy as jnp
from jax.experimental import pallas as pl
from jax.experimental.pallas import tpu as pltpu

_NEG_BIG = -1e30   # finite stand-in for -inf (avoids inf-inf NaN paths)


def _round_up(x, m):
    return ((x + m - 1) // m) * m


# ----------------------------------------------------------------------------
# Kernel 1 (fused relation + entity heads, tiled over rows):
#   hidden : [trow, S, H]  encoder last_hidden_state tile
#   w      : [1, H]        cls_layer.weight (lane-dense)
#   b      : [1]           cls_layer.bias (SMEM scalar)
#   labels : [trow, 1]     float 0/1 labels
# outputs per tile:
#   logits : [trow, 1]     raw classification logits
#   bce    : [trow, 1]     per-row BCE-with-logits terms (mean taken in JAX epilogue)
# ----------------------------------------------------------------------------
def clf_kernel(hidden_ref, w_ref, b_ref, labels_ref, logits_ref, bce_ref):
    h = hidden_ref[...]                                   # [trow, S, H] f32
    pooled = jnp.mean(h, axis=1)                          # [trow, H]  (torch.mean(dim=1))
    # TODO(synk): nn.Dropout(0.1) is identity in eval mode; training-mode RNG mask omitted.
    # VPU lane-reduction instead of a 1-column MXU matmul.
    z = jnp.sum(pooled * w_ref[...], axis=-1, keepdims=True) + b_ref[0]   # [trow, 1]
    logits_ref[...] = z
    y = labels_ref[...]                                   # [trow, 1] f32
    # BCEWithLogitsLoss per element (stable): max(z,0) - z*y + log1p(exp(-|z|))
    bce_ref[...] = jnp.maximum(z, 0.0) - z * y + jnp.log1p(jnp.exp(-jnp.abs(z)))


def clf_heads(hidden, cls_w, cls_b, labels, *, trow=8):
    """Mean-pool + shared cls head + per-row BCE terms, row-tiled."""
    rows, s, h = hidden.shape
    rows_pad = _round_up(max(rows, trow), trow)
    pad = rows_pad - rows
    hidden_p = jnp.pad(hidden.astype(jnp.float32), ((0, pad), (0, 0), (0, 0)))
    labels_p = jnp.pad(labels.astype(jnp.float32), ((0, pad), (0, 0)))
    w = cls_w.reshape(1, h).astype(jnp.float32)
    b = cls_b.reshape(1).astype(jnp.float32)
    n_tiles = rows_pad // trow

    logits, bce = pl.pallas_call(
        clf_kernel,
        out_shape=(jax.ShapeDtypeStruct((rows_pad, 1), jnp.float32),
                   jax.ShapeDtypeStruct((rows_pad, 1), jnp.float32)),
        grid_spec=pltpu.PrefetchScalarGridSpec(
            num_scalar_prefetch=0,
            grid=(n_tiles,),
            in_specs=[
                pl.BlockSpec((trow, s, h), lambda i: (i, 0, 0)),
                pl.BlockSpec((1, h), lambda i: (0, 0)),
                pl.BlockSpec(memory_space=pltpu.MemorySpace.SMEM),
                pl.BlockSpec((trow, 1), lambda i: (i, 0)),
            ],
            out_specs=[
                pl.BlockSpec((trow, 1), lambda i: (i, 0)),
                pl.BlockSpec((trow, 1), lambda i: (i, 0)),
            ]),
        compiler_params=pltpu.CompilerParams(
            dimension_semantics=("parallel",),
            vmem_limit_bytes=32 * 1024 * 1024),
        cost_estimate=pl.CostEstimate(
            flops=3 * rows_pad * s * h,
            transcendentals=2 * rows_pad,
            bytes_accessed=rows_pad * s * h * 4 + h * 4 + rows_pad * 12),
    )(hidden_p, w, b, labels_p)
    return logits[:rows], bce[:rows]


# ----------------------------------------------------------------------------
# Kernel 2 (generation cross-entropy, tiled over (row_tiles, vocab_tiles)):
#   dec    : [tbt, H]   bf16 decoder hidden tile (row-resident across vocab tiles)
#   wlm    : [H, tv]    bf16 lm_head vocab slab (streamed)
#   labels : [tbt, 1]   int32 target ids, -100 = ignore_index
# scratch (persists across the vocab reduction axis):
#   m_scr / s_scr : [tbt, 1] online log-sum-exp running max / sum
#   c_scr         : [tbt, 1] picked (correct-class) logit accumulator
# output (written on the last vocab tile):
#   nll    : [tbt, 1]   per-row NLL (0 for ignored rows); summed / averaged in JAX
# ----------------------------------------------------------------------------
def gen_loss_kernel(dec_ref, wlm_ref, labels_ref, nll_ref,
                    m_scr, s_scr, c_scr, *, true_vocab):
    vj = pl.program_id(1)

    @pl.when(vj == 0)
    def _():
        m_scr[...] = jnp.full_like(m_scr, _NEG_BIG)
        s_scr[...] = jnp.zeros_like(s_scr)
        c_scr[...] = jnp.zeros_like(c_scr)

    # bf16 x bf16 -> f32 MXU matmul for this vocab slab.
    logits = jnp.dot(dec_ref[...], wlm_ref[...],
                     preferred_element_type=jnp.float32)          # [tbt, tv] f32

    tv = logits.shape[1]
    labels = labels_ref[...]                                      # [tbt, 1] int32
    col = jax.lax.broadcasted_iota(jnp.int32, logits.shape, 1) + vj * tv
    # mask vocab-padding columns
    logits = jnp.where(col < true_vocab, logits, _NEG_BIG)

    # accumulate the picked (correct-class) logit for rows whose label lands in this tile
    pick = col == labels                                          # ignore rows (-100) never match
    c_scr[...] += jnp.sum(jnp.where(pick, logits, 0.0), axis=-1, keepdims=True)

    # online log-sum-exp over vocab tiles (flash-attention style rescale, f32 math)
    m_prev = m_scr[...]
    m_new = jnp.maximum(m_prev, jnp.max(logits, axis=-1, keepdims=True))
    s_scr[...] = (s_scr[...] * jnp.exp(m_prev - m_new)
                  + jnp.sum(jnp.exp(logits - m_new), axis=-1, keepdims=True))
    m_scr[...] = m_new

    @pl.when(vj == pl.num_programs(1) - 1)
    def _():
        lse = m_scr[...] + jnp.log(s_scr[...])
        valid = labels_ref[...] != -100
        nll_ref[...] = jnp.where(valid, lse - c_scr[...], 0.0)


def generation_loss(dec_hidden, lm_w, gen_labels):
    """Mean CE over non-ignored positions: softmax(dec_hidden @ lm_w) vs gen_labels."""
    b, t, h = dec_hidden.shape
    bt = b * t
    v = lm_w.shape[1]

    # Tile sizes: rows up to 256 (bf16 sublane multiple of 16), vocab slabs of 1024 lanes.
    tbt = min(256, _round_up(bt, 16))
    tv = min(1024, _round_up(v, 128))
    bt_pad = _round_up(bt, tbt)
    v_pad = _round_up(v, tv)
    n_row_tiles = bt_pad // tbt
    n_v_tiles = v_pad // tv

    dec = dec_hidden.reshape(bt, h).astype(jnp.bfloat16)
    dec_p = jnp.pad(dec, ((0, bt_pad - bt), (0, 0)))
    labels = gen_labels.reshape(bt, 1).astype(jnp.int32)
    labels_p = jnp.pad(labels, ((0, bt_pad - bt), (0, 0)), constant_values=-100)
    w_p = jnp.pad(lm_w.astype(jnp.bfloat16), ((0, 0), (0, v_pad - v)))

    kernel = functools.partial(gen_loss_kernel, true_vocab=v)
    nll = pl.pallas_call(
        kernel,
        out_shape=jax.ShapeDtypeStruct((bt_pad, 1), jnp.float32),
        grid_spec=pltpu.PrefetchScalarGridSpec(
            num_scalar_prefetch=0,
            grid=(n_row_tiles, n_v_tiles),
            in_specs=[
                pl.BlockSpec((tbt, h), lambda i, j: (i, 0)),   # resident across vocab axis
                pl.BlockSpec((h, tv), lambda i, j: (0, j)),    # streamed vocab slabs
                pl.BlockSpec((tbt, 1), lambda i, j: (i, 0)),
            ],
            out_specs=pl.BlockSpec((tbt, 1), lambda i, j: (i, 0)),
            scratch_shapes=[pltpu.VMEM((tbt, 1), jnp.float32)] * 3),
        compiler_params=pltpu.CompilerParams(
            dimension_semantics=("parallel", "arbitrary"),
            vmem_limit_bytes=32 * 1024 * 1024),
        cost_estimate=pl.CostEstimate(
            flops=2 * bt_pad * h * v_pad,
            transcendentals=bt_pad * v_pad,
            bytes_accessed=(bt_pad * h * 2 + n_row_tiles * h * v_pad * 2
                            + bt_pad * 4 + bt_pad * 4)),
    )(dec_p, w_p, labels_p)

    nll_flat = nll.reshape(bt_pad)[:bt]
    valid = (gen_labels.reshape(bt) != -100).astype(jnp.float32)
    # TODO(synk): PyTorch CrossEntropyLoss returns NaN if every target is ignored;
    # we clamp the denominator to 1 instead.
    denom = jnp.maximum(jnp.sum(valid), 1.0)
    return jnp.sum(nll_flat) / denom


# ----------------------------------------------------------------------------
# Module-level numeric forward (BCE path)
# ----------------------------------------------------------------------------
@functools.partial(jax.jit, static_argnames=("batch", "sample_size"))
def t5_multitask_forward(relation_hidden, entity_hidden, dec_hidden,
                         cls_w, cls_b, lm_w,
                         relation_labels, entity_labels, gen_labels,
                         batch, sample_size):
    """Numeric forward of T5_MultiTask_Relation_Entity_Concat (BCE path).

    Returns (total_loss, relation_logits, entity_logits, relation_filter_mask).
    """
    n = relation_hidden.shape[0]
    # The module uses ONE shared cls_layer for both relation and entity classification,
    # so the two heads are fused into a single row-tiled pallas_call.
    hidden_cat = jnp.concatenate([relation_hidden, entity_hidden], axis=0)   # [2N, S, H]
    labels_cat = jnp.concatenate([relation_labels, entity_labels], axis=0)   # [2N, 1]
    logits_all, bce_all = clf_heads(hidden_cat, cls_w, cls_b, labels_cat)

    rel_logits = logits_all[:n]
    ent_logits = logits_all[n:2 * n]
    rel_loss = jnp.mean(bce_all[:n])          # BCEWithLogitsLoss(reduction='mean')
    ent_loss = jnp.mean(bce_all[n:2 * n])

    # glue: "> 0" filter mask (actual string-candidate filtering stays host-side).
    rel_filter_mask = rel_logits.reshape(batch, sample_size) > 0.0

    gen_loss = generation_loss(dec_hidden, lm_w, gen_labels)

    total_loss = gen_loss + ent_loss + rel_loss
    return total_loss, rel_logits, ent_logits, rel_filter_mask


# ----------------------------------------------------------------------------
# Demo / smoke test
# ----------------------------------------------------------------------------
if __name__ == "__main__":
    key = jax.random.PRNGKey(0)
    k = jax.random.split(key, 8)

    batch = 2          # input_ids_gen.size(0)
    sample_size = 4    # self.sample_size
    n_rows = batch * sample_size
    seq = 8            # clf encoder sequence length
    hidden = 64        # stand-in for T5 hidden_size
    t_dec = 8          # decoder length
    vocab = 32         # stand-in vocab size

    # synthetic encoder / decoder hidden states (stand-ins for pretrained T5 outputs)
    relation_hidden = jax.random.normal(k[0], (n_rows, seq, hidden), jnp.float32)
    entity_hidden = jax.random.normal(k[1], (n_rows, seq, hidden), jnp.float32)
    dec_hidden = jax.random.normal(k[2], (batch, t_dec, hidden), jnp.float32)

    # parameters (shapes from __init__: cls_layer = Linear(hidden, 1), lm_head)
    cls_w = jax.random.normal(k[3], (hidden, 1), jnp.float32) * 0.05
    cls_b = jnp.zeros((1, 1), jnp.float32)
    lm_w = jax.random.normal(k[4], (hidden, vocab), jnp.float32) * 0.05

    # labels
    relation_labels = jax.random.bernoulli(k[5], 0.3, (n_rows, 1)).astype(jnp.float32)
    entity_labels = jax.random.bernoulli(k[6], 0.3, (n_rows, 1)).astype(jnp.float32)
    gen_labels = jax.random.randint(k[7], (batch, t_dec), 0, vocab, jnp.int32)
    gen_labels = gen_labels.at[:, -1].set(-100)   # exercise ignore_index

    total_loss, rel_logits, ent_logits, rel_mask = t5_multitask_forward(
        relation_hidden, entity_hidden, dec_hidden,
        cls_w, cls_b, lm_w,
        relation_labels, entity_labels, gen_labels,
        batch=batch, sample_size=sample_size)

    jax.block_until_ready(total_loss)
    jax.block_until_ready(rel_logits)
    jax.block_until_ready(ent_logits)
    jax.block_until_ready(rel_mask)
    print("KERNEL_OK")
</pallas_src>

<mosaic_0001>
module attributes {stable_mosaic.version = 11 : i64} {
  func.func @clf_kernel(%arg0: i32, %arg1: memref<8x8x64xf32, #tpu.memory_space<vmem>>, %arg2: memref<1x64xf32, #tpu.memory_space<vmem>>, %arg3: memref<1xf32, #tpu.memory_space<smem>>, %arg4: memref<8x1xf32, #tpu.memory_space<vmem>>, %arg5: memref<8x1xf32, #tpu.memory_space<vmem>>, %arg6: memref<8x1xf32, #tpu.memory_space<vmem>>) attributes {dimension_semantics = [#tpu.dimension_semantics<parallel>], iteration_bounds = array<i64: 2>, scalar_prefetch = 0 : i64, scratch_operands = 0 : i64, tpu.core_type = #tpu.core_type<tc>, window_params = [{transform_indices = @transform_0, window_bounds = array<i64: 8, 8, 64>}, {pipeline_mode = #tpu.pipeline_mode<synchronous>, transform_indices = @transform_1, window_bounds = array<i64: 1, 64>}, {transform_indices = @transform_2, window_bounds = array<i64: 1>}, {transform_indices = @transform_3, window_bounds = array<i64: 8, 1>}, {transform_indices = @transform_4, window_bounds = array<i64: 8, 1>}, {transform_indices = @transform_5, window_bounds = array<i64: 8, 1>}]} {
    %c0 = arith.constant 0 : index
    %c0_0 = arith.constant 0 : index
    %c0_1 = arith.constant 0 : index
    %0 = vector.load %arg1[%c0, %c0_0, %c0_1] : memref<8x8x64xf32, #tpu.memory_space<vmem>>, vector<8x8x64xf32>
    %cst = arith.constant dense<0.000000e+00> : vector<8x64xf32>
    %1 = vector.multi_reduction <add>, %0, %cst [1] : vector<8x8x64xf32> to vector<8x64xf32>
    %cst_2 = arith.constant 8.000000e+00 : f32
    %2 = vector.broadcast %cst_2 : f32 to vector<8x64xf32>
    %3 = arith.divf %1, %2 : vector<8x64xf32>
    %c0_3 = arith.constant 0 : index
    %c0_4 = arith.constant 0 : index
    %4 = vector.load %arg2[%c0_3, %c0_4] : memref<1x64xf32, #tpu.memory_space<vmem>>, vector<1x64xf32>
    %5 = vector.broadcast %4 : vector<1x64xf32> to vector<8x64xf32>
    %6 = arith.mulf %3, %5 : vector<8x64xf32>
    %cst_5 = arith.constant dense<0.000000e+00> : vector<8xf32>
    %7 = vector.multi_reduction <add>, %6, %cst_5 [1] : vector<8x64xf32> to vector<8xf32>
    %8 = vector.shape_cast %7 : vector<8xf32> to vector<8x1xf32>
    %c0_6 = arith.constant 0 : index
    %9 = memref.load %arg3[%c0_6] : memref<1xf32, #tpu.memory_space<smem>>
    %10 = vector.broadcast %9 : f32 to vector<8x1xf32>
    %11 = arith.addf %8, %10 : vector<8x1xf32>
    %c0_7 = arith.constant 0 : index
    %c0_8 = arith.constant 0 : index
    %12 = vector.load %arg5[%c0_7, %c0_8] : memref<8x1xf32, #tpu.memory_space<vmem>>, vector<8x1xf32>
    tpu.vector_store %arg5[%c0_7, %c0_8], %11 {strides = array<i32>} : memref<8x1xf32, #tpu.memory_space<vmem>>, vector<8x1xf32>,
    %c0_9 = arith.constant 0 : index
    %c0_10 = arith.constant 0 : index
    %13 = vector.load %arg4[%c0_9, %c0_10] : memref<8x1xf32, #tpu.memory_space<vmem>>, vector<8x1xf32>
    %cst_11 = arith.constant 0.000000e+00 : f32
    %14 = vector.broadcast %cst_11 : f32 to vector<8x1xf32>
    %15 = arith.maximumf %11, %14 : vector<8x1xf32>
    %16 = arith.mulf %11, %13 : vector<8x1xf32>
    %17 = arith.subf %15, %16 : vector<8x1xf32>
    %18 = math.absf %11 : vector<8x1xf32>
    %cst_12 = arith.constant 0.000000e+00 : f32
    %19 = vector.broadcast %cst_12 : f32 to vector<8x1xf32>
    %20 = arith.subf %19, %18 : vector<8x1xf32>
    %21 = math.exp %20 : vector<8x1xf32>
    %22 = math.log1p %21 : vector<8x1xf32>
    %23 = arith.addf %17, %22 : vector<8x1xf32>
    %c0_13 = arith.constant 0 : index
    %c0_14 = arith.constant 0 : index
    %24 = vector.load %arg6[%c0_13, %c0_14] : memref<8x1xf32, #tpu.memory_space<vmem>>, vector<8x1xf32>
    tpu.vector_store %arg6[%c0_13, %c0_14], %23 {strides = array<i32>} : memref<8x1xf32, #tpu.memory_space<vmem>>, vector<8x1xf32>,
    return
  }
  func.func @transform_0(%arg0: i32) -> (i32, i32, i32) {
    %c0_i32 = arith.constant 0 : i32
    %c0_i32_0 = arith.constant 0 : i32
    %c0_i32_1 = arith.constant 0 : i32
    return %arg0, %c0_i32, %c0_i32_0 : i32, i32, i32
  }
  func.func @transform_1(%arg0: i32) -> (i32, i32) {
    %c0_i32 = arith.constant 0 : i32
    %c0_i32_0 = arith.constant 0 : i32
    %c0_i32_1 = arith.constant 0 : i32
    return %c0_i32, %c0_i32_0 : i32, i32
  }
  func.func @transform_2(%arg0: i32) -> i32 {
    %c0_i32 = arith.constant 0 : i32
    %c0_i32_0 = arith.constant 0 : i32
    return %c0_i32 : i32
  }
  func.func @transform_3(%arg0: i32) -> (i32, i32) {
    %c0_i32 = arith.constant 0 : i32
    %c0_i32_0 = arith.constant 0 : i32
    return %arg0, %c0_i32 : i32, i32
  }
  func.func @transform_4(%arg0: i32) -> (i32, i32) {
    %c0_i32 = arith.constant 0 : i32
    %c0_i32_0 = arith.constant 0 : i32
    return %arg0, %c0_i32 : i32, i32
  }
  func.func @transform_5(%arg0: i32) -> (i32, i32) {
    %c0_i32 = arith.constant 0 : i32
    %c0_i32_0 = arith.constant 0 : i32
    return %arg0, %c0_i32 : i32, i32
  }
}

module attributes {stable_mosaic.version = 11 : i64} {
  func.func @gen_loss_kernel(%arg0: i32, %arg1: i32, %arg2: memref<16x64xbf16, #tpu.memory_space<vmem>>, %arg3: memref<64x128xbf16, #tpu.memory_space<vmem>>, %arg4: memref<16x1xi32, #tpu.memory_space<vmem>>, %arg5: memref<16x1xf32, #tpu.memory_space<vmem>>, %arg6: memref<16x1xf32, #tpu.memory_space<vmem>>, %arg7: memref<16x1xf32, #tpu.memory_space<vmem>>, %arg8: memref<16x1xf32, #tpu.memory_space<vmem>>) attributes {dimension_semantics = [#tpu.dimension_semantics<parallel>, #tpu.dimension_semantics<arbitrary>], iteration_bounds = array<i64: 1, 1>, scalar_prefetch = 0 : i64, scratch_operands = 3 : i64, tpu.core_type = #tpu.core_type<tc>, window_params = [{transform_indices = @transform_0, window_bounds = array<i64: 16, 64>}, {transform_indices = @transform_1, window_bounds = array<i64: 64, 128>}, {transform_indices = @transform_2, window_bounds = array<i64: 16, 1>}, {transform_indices = @transform_3, window_bounds = array<i64: 16, 1>}]} {
    %c0_i32 = arith.constant 0 : i32
    %0 = arith.cmpi eq, %arg1, %c0_i32 : i32
    %1 = arith.extui %0 : i1 to i32
    %c0_i32_0 = arith.constant 0 : i32
    %2 = arith.cmpi ne, %1, %c0_i32_0 : i32
    scf.if %2 {
      %cst_25 = arith.constant -1.000000e+30 : f32
      %43 = vector.broadcast %cst_25 : f32 to vector<16x1xf32>
      %c0_26 = arith.constant 0 : index
      %c0_27 = arith.constant 0 : index
      %44 = vector.load %arg6[%c0_26, %c0_27] : memref<16x1xf32, #tpu.memory_space<vmem>>, vector<16x1xf32>
      tpu.vector_store %arg6[%c0_26, %c0_27], %43 {strides = array<i32>} : memref<16x1xf32, #tpu.memory_space<vmem>>, vector<16x1xf32>,
      %cst_28 = arith.constant 0.000000e+00 : f32
      %45 = vector.broadcast %cst_28 : f32 to vector<16x1xf32>
      %c0_29 = arith.constant 0 : index
      %c0_30 = arith.constant 0 : index
      %46 = vector.load %arg7[%c0_29, %c0_30] : memref<16x1xf32, #tpu.memory_space<vmem>>, vector<16x1xf32>
      tpu.vector_store %arg7[%c0_29, %c0_30], %45 {strides = array<i32>} : memref<16x1xf32, #tpu.memory_space<vmem>>, vector<16x1xf32>,
      %cst_31 = arith.constant 0.000000e+00 : f32
      %47 = vector.broadcast %cst_31 : f32 to vector<16x1xf32>
      %c0_32 = arith.constant 0 : index
      %c0_33 = arith.constant 0 : index
      %48 = vector.load %arg8[%c0_32, %c0_33] : memref<16x1xf32, #tpu.memory_space<vmem>>, vector<16x1xf32>
      tpu.vector_store %arg8[%c0_32, %c0_33], %47 {strides = array<i32>} : memref<16x1xf32, #tpu.memory_space<vmem>>, vector<16x1xf32>,
    } else {
    }
    %c0 = arith.constant 0 : index
    %c0_1 = arith.constant 0 : index
    %3 = vector.load %arg2[%c0, %c0_1] : memref<16x64xbf16, #tpu.memory_space<vmem>>, vector<16x64xbf16>
    %c0_2 = arith.constant 0 : index
    %c0_3 = arith.constant 0 : index
    %4 = vector.load %arg3[%c0_2, %c0_3] : memref<64x128xbf16, #tpu.memory_space<vmem>>, vector<64x128xbf16>
    %cst = arith.constant dense<0.000000e+00> : vector<16x128xf32>
    %5 = tpu.matmul %3, %4, %cst {dimension_numbers = #tpu.dot_dimension_numbers<[1], [0], [0], [1], [0, 0, 1, 1], [], []>} : vector<16x64xbf16>, vector<64x128xbf16>, vector<16x128xf32> -> vector<16x128xf32>
    %c0_4 = arith.constant 0 : index
    %c0_5 = arith.constant 0 : index
    %6 = vector.load %arg4[%c0_4, %c0_5] : memref<16x1xi32, #tpu.memory_space<vmem>>, vector<16x1xi32>
    %7 = tpu.iota {dimensions = array<i32: 1>} : vector<16x128xi32>
    %c128_i32 = arith.constant 128 : i32
    %8 = arith.muli %arg1, %c128_i32 : i32
    %9 = vector.broadcast %8 : i32 to vector<16x128xi32>
    %10 = arith.addi %7, %9 : vector<16x128xi32>
    %c32_i32 = arith.constant 32 : i32
    %11 = vector.broadcast %c32_i32 : i32 to vector<16x128xi32>
    %12 = arith.cmpi slt, %10, %11 : vector<16x128xi32>
    %cst_6 = arith.constant -1.000000e+30 : f32
    %13 = vector.broadcast %cst_6 : f32 to vector<16x128xf32>
    %14 = arith.select %12, %5, %13 : vector<16x128xi1>, vector<16x128xf32>
    %15 = vector.broadcast %6 : vector<16x1xi32> to vector<16x128xi32>
    %16 = arith.cmpi eq, %10, %15 : vector<16x128xi32>
    %c0_7 = arith.constant 0 : index
    %c0_8 = arith.constant 0 : index
    %17 = vector.load %arg8[%c0_7, %c0_8] : memref<16x1xf32, #tpu.memory_space<vmem>>, vector<16x1xf32>
    %cst_9 = arith.constant 0.000000e+00 : f32
    %18 = vector.broadcast %cst_9 : f32 to vector<16x128xf32>
    %19 = arith.select %16, %14, %18 : vector<16x128xi1>, vector<16x128xf32>
    %cst_10 = arith.constant dense<0.000000e+00> : vector<16xf32>
    %20 = vector.multi_reduction <add>, %19, %cst_10 [1] : vector<16x128xf32> to vector<16xf32>
    %21 = vector.shape_cast %20 : vector<16xf32> to vector<16x1xf32>
    %22 = arith.addf %17, %21 : vector<16x1xf32>
    %c0_11 = arith.constant 0 : index
    %c0_12 = arith.constant 0 : index
    %23 = vector.load %arg8[%c0_11, %c0_12] : memref<16x1xf32, #tpu.memory_space<vmem>>, vector<16x1xf32>
    tpu.vector_store %arg8[%c0_11, %c0_12], %22 {strides = array<i32>} : memref<16x1xf32, #tpu.memory_space<vmem>>, vector<16x1xf32>,
    %c0_13 = arith.constant 0 : index
    %c0_14 = arith.constant 0 : index
    %24 = vector.load %arg6[%c0_13, %c0_14] : memref<16x1xf32, #tpu.memory_space<vmem>>, vector<16x1xf32>
    %cst_15 = arith.constant dense<0xFF800000> : vector<16xf32>
    %25 = vector.multi_reduction <maximumf>, %14, %cst_15 [1] : vector<16x128xf32> to vector<16xf32>
    %26 = vector.shape_cast %25 : vector<16xf32> to vector<16x1xf32>
    %27 = arith.maximumf %24, %26 : vector<16x1xf32>
    %c0_16 = arith.constant 0 : index
    %c0_17 = arith.constant 0 : index
    %28 = vector.load %arg7[%c0_16, %c0_17] : memref<16x1xf32, #tpu.memory_space<vmem>>, vector<16x1xf32>
    %29 = arith.subf %24, %27 : vector<16x1xf32>
    %30 = math.exp %29 : vector<16x1xf32>
    %31 = arith.mulf %28, %30 : vector<16x1xf32>
    %32 = vector.broadcast %27 : vector<16x1xf32> to vector<16x128xf32>
    %33 = arith.subf %14, %32 : vector<16x128xf32>
    %34 = math.exp %33 : vector<16x128xf32>
    %cst_18 = arith.constant dense<0.000000e+00> : vector<16xf32>
    %35 = vector.multi_reduction <add>, %34, %cst_18 [1] : vector<16x128xf32> to vector<16xf32>
    %36 = vector.shape_cast %35 : vector<16xf32> to vector<16x1xf32>
    %37 = arith.addf %31, %36 : vector<16x1xf32>
    %c0_19 = arith.constant 0 : index
    %c0_20 = arith.constant 0 : index
    %38 = vector.load %arg7[%c0_19, %c0_20] : memref<16x1xf32, #tpu.memory_space<vmem>>, vector<16x1xf32>
    tpu.vector_store %arg7[%c0_19, %c0_20], %37 {strides = array<i32>} : memref<16x1xf32, #tpu.memory_space<vmem>>, vector<16x1xf32>,
    %c0_21 = arith.constant 0 : index
    %c0_22 = arith.constant 0 : index
    %39 = vector.load %arg6[%c0_21, %c0_22] : memref<16x1xf32, #tpu.memory_space<vmem>>, vector<16x1xf32>
    tpu.vector_store %arg6[%c0_21, %c0_22], %27 {strides = array<i32>} : memref<16x1xf32, #tpu.memory_space<vmem>>, vector<16x1xf32>,
    %c0_i32_23 = arith.constant 0 : i32
    %40 = arith.cmpi eq, %arg1, %c0_i32_23 : i32
    %41 = arith.extui %40 : i1 to i32
    %c0_i32_24 = arith.constant 0 : i32
    %42 = arith.cmpi ne, %41, %c0_i32_24 : i32
    scf.if %42 {
      %c0_25 = arith.constant 0 : index
      %c0_26 = arith.constant 0 : index
      %43 = vector.load %arg6[%c0_25, %c0_26] : memref<16x1xf32, #tpu.memory_space<vmem>>, vector<16x1xf32>
      %c0_27 = arith.constant 0 : index
      %c0_28 = arith.constant 0 : index
      %44 = vector.load %arg7[%c0_27, %c0_28] : memref<16x1xf32, #tpu.memory_space<vmem>>, vector<16x1xf32>
      %45 = math.log %44 : vector<16x1xf32>
      %46 = arith.addf %43, %45 : vector<16x1xf32>
      %c0_29 = arith.constant 0 : index
      %c0_30 = arith.constant 0 : index
      %47 = vector.load %arg4[%c0_29, %c0_30] : memref<16x1xi32, #tpu.memory_space<vmem>>, vector<16x1xi32>
      %c-100_i32 = arith.constant -100 : i32
      %48 = vector.broadcast %c-100_i32 : i32 to vector<16x1xi32>
      %49 = arith.cmpi ne, %47, %48 : vector<16x1xi32>
      %c0_31 = arith.constant 0 : index
      %c0_32 = arith.constant 0 : index
      %50 = vector.load %arg8[%c0_31, %c0_32] : memref<16x1xf32, #tpu.memory_space<vmem>>, vector<16x1xf32>
      %51 = arith.subf %46, %50 : vector<16x1xf32>
      %cst_33 = arith.constant 0.000000e+00 : f32
      %52 = vector.broadcast %cst_33 : f32 to vector<16x1xf32>
      %53 = arith.select %49, %51, %52 : vector<16x1xi1>, vector<16x1xf32>
      %c0_34 = arith.constant 0 : index
      %c0_35 = arith.constant 0 : index
      %54 = vector.load %arg5[%c0_34, %c0_35] : memref<16x1xf32, #tpu.memory_space<vmem>>, vector<16x1xf32>
      tpu.vector_store %arg5[%c0_34, %c0_35], %53 {strides = array<i32>} : memref<16x1xf32, #tpu.memory_space<vmem>>, vector<16x1xf32>,
    } else {
    }
    return
  }
  func.func @transform_0(%arg0: i32, %arg1: i32) -> (i32, i32) {
    %c0_i32 = arith.constant 0 : i32
    %c0_i32_0 = arith.constant 0 : i32
    return %arg0, %c0_i32 : i32, i32
  }
  func.func @transform_1(%arg0: i32, %arg1: i32) -> (i32, i32) {
    %c0_i32 = arith.constant 0 : i32
    %c0_i32_0 = arith.constant 0 : i32
    return %c0_i32, %arg1 : i32, i32
  }
  func.func @transform_2(%arg0: i32, %arg1: i32) -> (i32, i32) {
    %c0_i32 = arith.constant 0 : i32
    %c0_i32_0 = arith.constant 0 : i32
    return %arg0, %c0_i32 : i32, i32
  }
  func.func @transform_3(%arg0: i32, %arg1: i32) -> (i32, i32) {
    %c0_i32 = arith.constant 0 : i32
    %c0_i32_0 = arith.constant 0 : i32
    return %arg0, %c0_i32 : i32, i32
  }
}

</mosaic_0001>

<bundles_post_ra>
// kernel: t5_multitask_forward.2
= control target key start
LH: loop header
LB: loop body
LE: loop exit
PB: predicated region body
PF: predicated region fallthrough
CT: control target
= control target key end

     0   :  { %s562_s20 = smov 0   ;;  %s611_s0 = inlined_call_operand.vmem [shape: f32[16,8,64], index: 0, kind: input, shape index: {}]   ;;  %s612_s1 = inlined_call_operand.vmem [shape: f32[1,64], index: 1, kind: input, shape index: {}]   ;;  %s613_s2 = inlined_call_operand.<no memory space> [shape: f32[1], index: 2, kind: input, shape index: {}]   ;;  %s614_s3 = inlined_call_operand.vmem [shape: f32[16,1], index: 3, kind: input, shape index: {}]   ;;  %s615_s4 = inlined_call_operand.vmem [shape: f32[16,1], index: 4, kind: output, shape index: {0}]   ;;  %s616_s5 = inlined_call_operand.vmem [shape: f32[16,1], index: 5, kind: output, shape index: {1}]  }
   0x1   :  { %11 = sst [smem:[#allocation2]] %s613_s2 }
   0x2 LB: > { %s568_s21 = sadd.s32 4294967295, %s527_s20   ;;  %p500_p0 = scmp.ge.s32.totalorder %s527_s20, 1  ;;  %s527_s20 = sphi %s562_s20, %s17_s20  }
   0x3   : > { %p201_p1 = scmp.lt.s32.totalorder %s527_s20, 3 }
   0x5   : > { %p202_p2 = pnand %p500_p0, %p201_p1 }
   0x6   : > { %s501_s22 = sshll.u32 (!%p202_p2), %s568_s21, 3  ;;  %vm262_vm0 = vcmask (!%p202_p2), 523264   ;;  %vm352_vm1 = vcmask (!%p202_p2), 1041409   ;;  %vm355_vm2 = vcmask (!%p202_p2), 1042434   ;;  %v506_v59 = vld [vmem:[%s612_s1] ss:$0 sm:$0xff] (!%p202_p2) }
   0x7   : > { %205 = sbr.rel (%p202_p2) target bundleno = 225 (0xe1), region = 36  ;;  %p237_p3 = scmp.lt.s32.totalorder (!%p202_p2), %s501_s22, 15  ;;  %vm358_vm3 = vcmask (!%p202_p2), 1043459   ;;  %vm361_vm4 = vcmask (!%p202_p2), 1044484   ;;  %vm364_vm5 = vcmask (!%p202_p2), 1045509   ;;  %vm367_vm6 = vcmask (!%p202_p2), 1046534  }
   0x8   : > { %vm370_vm7 = vcmask (!%p202_p2), 1047559   ;;  %p242_p4 = scmp.lt.s32.totalorder (!%p202_p2), %s568_s21, 1  ;;  %s376_s28 = sld [smem:[#allocation2]] (!%p202_p2)  ;;  %vm379_vm8 = vcmask (!%p202_p2), 7168  }
   0xe   : > { %s618_s22 = smov (!%p237_p3, %s501_s22), 15  ;;  %s620_s21 = smov (!%p242_p4, %s568_s21), 1 }
   0xf   : > { %s502_s2 = sshll.u32 %s618_s22, 3  ;;  %s592_s29 = sshll.u32 %s620_s21, 3 }
  0x10   : > { %s240_s25 = scalar_lea.vmem %s611_s0, %s502_s2  ;;  %s249_s7 = scalar_lea.vmem %s615_s4, %s592_s29 }
  0x11   : > { %v254_v0 = vld [vmem:[%s240_s25] sm:$0xff]  ;;  %v255_v1 = vld [vmem:[%s240_s25 + $0x8] sm:$0xff]  ;;  %v256_v2 = vld [vmem:[%s240_s25 + $0x10] sm:$0xff]  ;;  %s245_s10 = scalar_lea.vmem %s614_s3, %s592_s29  ;;  %s253_s13 = scalar_lea.vmem %s616_s5, %s592_s29 }
  0x12   : > { %v257_v3 = vld [vmem:[%s240_s25 + $0x18] sm:$0xff]  ;;  %v258_v4 = vld [vmem:[%s240_s25 + $0x20] sm:$0xff]  ;;  %v259_v5 = vld [vmem:[%s240_s25 + $0x28] sm:$0xff]  ;;  %v263_v6 = vsel %vm262_vm0, %v254_v0, 0.0  ;;  %v270_v7 = vsel %vm262_vm0, %v255_v1, 0.0  ;;  %v277_v8 = vsel %vm262_vm0, %v256_v2, 0.0 }
  0x13   : > { %v260_v9 = vld [vmem:[%s240_s25 + $0x30] sm:$0xff]  ;;  %v261_v10 = vld [vmem:[%s240_s25 + $0x38] sm:$0xff]  ;;  %v264_v11 = vrot.slane %v263_v6, 4  ;;  %v271_v12 = vrot.slane %v270_v7, 4  ;;  %v278_v13 = vrot.slane %v277_v8, 4  ;;  %v284_v14 = vsel %vm262_vm0, %v257_v3, 0.0 }
  0x14   : > { %v285_v15 = vrot.slane %v284_v14, 4  ;;  %v291_v16 = vsel %vm262_vm0, %v258_v4, 0.0  ;;  %v298_v17 = vsel %vm262_vm0, %v259_v5, 0.0  ;;  %v305_v18 = vsel %vm262_vm0, %v260_v9, 0.0 }
  0x15   : > { %v265_v19 = vadd.f32 %v264_v11, %v263_v6  ;;  %v272_v20 = vadd.f32 %v271_v12, %v270_v7  ;;  %v279_v21 = vadd.f32 %v278_v13, %v277_v8  ;;  %v292_v22 = vrot.slane %v291_v16, 4 }
  0x16   : > { %v286_v23 = vadd.f32 %v285_v15, %v284_v14  ;;  %v299_v24 = vrot.slane %v298_v17, 4  ;;  %v306_v25 = vrot.slane %v305_v18, 4  ;;  %v312_v26 = vsel %vm262_vm0, %v261_v10, 0.0 }
  0x17   : > { %v266_v27 = vrot.slane %v265_v19, 2  ;;  %v273_v28 = vrot.slane %v272_v20, 2  ;;  %v280_v29 = vrot.slane %v279_v21, 2  ;;  %v293_v30 = vadd.f32 %v292_v22, %v291_v16 }
  0x18   : > { %v287_v31 = vrot.slane %v286_v23, 2  ;;  %v300_v32 = vadd.f32 %v299_v24, %v298_v17  ;;  %v307_v33 = vadd.f32 %v306_v25, %v305_v18  ;;  %v313_v34 = vrot.slane %v312_v26, 4 }
  0x19   : > { %v267_v35 = vadd.f32 %v266_v27, %v265_v19  ;;  %v274_v36 = vadd.f32 %v273_v28, %v272_v20  ;;  %v281_v37 = vadd.f32 %v280_v29, %v279_v21  ;;  %v294_v38 = vrot.slane %v293_v30, 2 }
  0x1a   : > { %v288_v39 = vadd.f32 %v287_v31, %v286_v23  ;;  %v301_v40 = vrot.slane %v300_v32, 2  ;;  %v308_v41 = vrot.slane %v307_v33, 2  ;;  %v314_v42 = vadd.f32 %v313_v34, %v312_v26 }
  0x1b   : > { %v268_v43 = vrot.slane %v267_v35, 1  ;;  %v275_v44 = vrot.slane %v274_v36, 1  ;;  %v282_v45 = vrot.slane %v281_v37, 1  ;;  %v295_v46 = vadd.f32 %v294_v38, %v293_v30 }
  0x1c   : > { %v289_v47 = vrot.slane %v288_v39, 1  ;;  %v302_v48 = vadd.f32 %v301_v40, %v300_v32  ;;  %v309_v49 = vadd.f32 %v308_v41, %v307_v33  ;;  %v315_v50 = vrot.slane %v314_v42, 2  ;;  %v381_v41 = vld [vmem:[%s245_s10] sm:$0xff] }
  0x1d   : > { %v269_v51 = vadd.f32 %v268_v43, %v267_v35  ;;  %v276_v52 = vadd.f32 %v275_v44, %v274_v36  ;;  %v283_v53 = vadd.f32 %v282_v45, %v281_v37  ;;  %v296_v54 = vrot.slane %v295_v46, 1 }
  0x1e   : > { %v290_v55 = vadd.f32 %v289_v47, %v288_v39  ;;  %v303_v56 = vrot.slane %v302_v48, 1  ;;  %v310_v57 = vrot.slane %v309_v49, 1  ;;  %v316_v58 = vadd.f32 %v315_v50, %v314_v42 }
  0x1f   : > { %v297_v60 = vadd.f32 %v296_v54, %v295_v46  ;;  %v320_v61 = vmul.f32 0.125, %v269_v51  ;;  %v321_v62 = vmul.f32 0.125, %v276_v52  ;;  %v322_v63 = vmul.f32 0.125, %v283_v53 }
  0x20   : > { %v304_v0 = vadd.f32 %v303_v56, %v302_v48  ;;  %v311_v1 = vadd.f32 %v310_v57, %v309_v49  ;;  %v317_v2 = vrot.slane %v316_v58, 1  ;;  %v323_v3 = vmul.f32 0.125, %v290_v55 }
  0x21   : > { %v324_v4 = vmul.f32 0.125, %v297_v60  ;;  %v335_v5 = vmul.f32 %v506_v59, %v320_v61  ;;  %v336_v6 = vmul.f32 %v506_v59, %v321_v62  ;;  %v337_v7 = vmul.f32 %v506_v59, %v322_v63 }
  0x22   : > { %v318_v8 = vadd.f32 %v317_v2, %v316_v58  ;;  %v325_v9 = vmul.f32 0.125, %v304_v0  ;;  %v326_v10 = vmul.f32 0.125, %v311_v1  ;;  %v338_v11 = vmul.f32 %v506_v59, %v323_v3 }
  0x23   : > { %v339_v12 = vmul.f32 %v506_v59, %v324_v4  ;;  %v351_v13 = vrot.slane %v336_v6, 7  ;;  %v354_v14 = vrot.slane %v337_v7, 6  ;;  %v377_v32 = vstv %s376_s28 }
  0x24   : > { %v327_v15 = vmul.f32 0.125, %v318_v8  ;;  %v340_v16 = vmul.f32 %v506_v59, %v325_v9  ;;  %v341_v17 = vmul.f32 %v506_v59, %v326_v10  ;;  %v357_v18 = vrot.slane %v338_v11, 5 }
  0x25   : > { %v353_v19 = vsel %vm352_vm1, %v351_v13, %v335_v5  ;;  %v360_v20 = vrot.slane %v339_v12, 4 }
  0x26   : > { %v342_v21 = vmul.f32 %v506_v59, %v327_v15  ;;  %v356_v22 = vsel %vm355_vm2, %v354_v14, %v353_v19  ;;  %v363_v23 = vrot.slane %v340_v16, 3  ;;  %v366_v24 = vrot.slane %v341_v17, 2 }
  0x27   : > { %v359_v25 = vsel %vm358_vm3, %v357_v18, %v356_v22 }
  0x28   : > { %v362_v26 = vsel %vm361_vm4, %v360_v20, %v359_v25  ;;  %v369_v27 = vrot.slane %v342_v21, 1 }
  0x29   : > { %v365_v28 = vsel %vm364_vm5, %v363_v23, %v362_v26 }
  0x2a   : > { %v368_v29 = vsel %vm367_vm6, %v366_v24, %v365_v28 }
  0x2b   : > { %v371_v30 = vsel %vm370_vm7, %v369_v27, %v368_v29 }
  0x2c   : > { %v373_v31 = vsel %vm262_vm0, %v371_v30, 0.0 }
  0x2d   : > { %374 = vadd.xlane.f32.xlu0 %v373_v31 }
  0xba   : > { %v375_v33 = vpop.xlane.xlu0 %374 }
  0xbb   : > { %v378_v34 = vadd.f32 %v377_v32, %v375_v33 }
  0xbd   : > { %380 = vst.msk [vmem:[%s249_s7] sm:$0xff] %vm379_vm8, %v378_v34  ;;  %v385_v35 = vand.u32 2147483647, %v378_v34  ;;  %v382_v43 = vmax.f32 %v378_v34, 0.0  ;;  %v383_v44 = vmul.f32 %v381_v41, %v378_v34 }
  0xbf   : > { %v386_v36 = vsub.f32 0.0, %v385_v35  ;;  %v384_v49 = vsub.f32 %v382_v43, %v383_v44 }
  0xc1   : > { %v387_v37 = vmul.f32 1.442695, %v386_v36 }
  0xc3   : > { %517 = vpow2.f32 %v387_v37 }
  0xcd   : > { %v518_v38 = vpop.eup %517 }
  0xce   : > { %v389_v39 = vadd.f32 1.0, %v518_v38  ;;  %v392_v40 = vmul.f32 -0.5, %v518_v38  ;;  %v395_v45 = vand.u32 2147483647, %v518_v38 }
  0xd0   : > { %519 = vlog2.f32 %v389_v39  ;;  %v393_v42 = vadd.f32 1.0, %v392_v40  ;;  %vm396_vm9 = vcmp.lt.f32.partialorder %v395_v45, 0.0004427343 }
  0xd2   : > { %v394_v48 = vmul.f32 %v518_v38, %v393_v42 }
  0xda   : > { %v520_v46 = vpop.eup %519 }
  0xdb   : > { %v391_v47 = vmul.f32 0.6931472, %v520_v46 }
  0xdd   : > { %v397_v50 = vsel %vm396_vm9, %v394_v48, %v391_v47 }
  0xde   : > { %v398_v51 = vadd.f32 %v397_v50, %v384_v49 }
  0xe0   : > { %399 = vst.msk [vmem:[%s253_s13] sm:$0xff] %vm379_vm8, %v398_v51 }
  0xe1 PF: > { %s17_s20 = sadd.s32 1, %s527_s20  }
  0xe2   : > { %p14_p5 = scmp.ge.s32.totalorder %s17_s20, 4  }
  0xe4   :  { %16 = sbr.rel (!%p14_p5) target bundleno = 2 (0x2), region = 81 }

// kernel: t5_multitask_forward.3
= control target key start
LH: loop header
LB: loop body
LE: loop exit
PB: predicated region body
PF: predicated region fallthrough
CT: control target
= control target key end

     0   :  { %v260_v0 = vmov 0.0   ;;  %vm261_vm0 = vmmov 0   ;;  %vm65_vm1 = vcmask 523264   ;;  %v262_v6 = vmov 0   ;;  %s333_s1 = inlined_call_operand.vmem [shape: bf16[64,128], index: 1, kind: input, shape index: {}]   ;;  %s334_s0 = inlined_call_operand.vmem [shape: bf16[16,64], index: 0, kind: input, shape index: {}]   ;;  %s335_s2 = inlined_call_operand.vmem [shape: s32[16,1], index: 2, kind: input, shape index: {}]   ;;  %s336_s3 = inlined_call_operand.vmem [shape: f32[16,1], index: 3, kind: output, shape index: {}]  }
   0x1   :  { %225 = vmatprep.subr.bf16.mxu0 %v260_v0  ;;  %v243_v1 = vld [vmem:[%s333_s1] sm:$0xff]   ;;  %233 = vmatprep.mubr.msk.bf16.mxu0 %vm261_vm0, %v260_v0  ;;  %v244_v2 = vld [vmem:[%s333_s1 + $0x8] sm:$0xff]   ;;  %v245_v3 = vld [vmem:[%s333_s1 + $0x10] sm:$0xff]   ;;  %vm19_vm2 = vcmask 7168   ;;  %v263_v7 = vmov -1e+30   ;;  %v112_v8 = vlaneseq }
   0x2   :  { %226 = vmatpush3.bf16.msra.mxu0 %v243_v1  ;;  %v246_v4 = vld [vmem:[%s333_s1 + $0x18] sm:$0xff]   ;;  %v247_v5 = vld [vmem:[%s334_s0] sm:$0xff]   ;;  %242 = vset.pattern.permute.xlu0 %v262_v6  ;;  %20 = vst.msk [vmem:[#allocation2] sm:$0xff] %vm19_vm2, %v263_v7  ;;  %21 = vst.msk [vmem:[#allocation2 + $0x8] sm:$0xff] %vm19_vm2, %v263_v7 }
   0x3   :  { %227 = vmatprep.subr.bf16.mxu0 %v260_v0  ;;  %241 = vset.pattern.permute.xlu1 %v262_v6  ;;  %22 = vst.msk [vmem:[#allocation3] sm:$0xff] %vm19_vm2, %v260_v0  ;;  %23 = vst.msk [vmem:[#allocation3 + $0x8] sm:$0xff] %vm19_vm2, %v260_v0  ;;  %v113_v9 = vand.u32 127, %v112_v8  ;;  %v308_v16 = vld [vmem:[%s335_s2] sm:$0xff]  ;;  %v316_v25 = vld [vmem:[%s335_s2 + $0x8] sm:$0xff] }
   0x4   :  { %24 = vst.msk [vmem:[#allocation4] sm:$0xff] %vm19_vm2, %v260_v0  ;;  %25 = vst.msk [vmem:[#allocation4 + $0x8] sm:$0xff] %vm19_vm2, %v260_v0  ;;  %vm200_vm6 = vcmp.ne.s32.totalorder %v308_v16, 4294967196  ;;  %vm201_vm7 = vcmp.ne.s32.totalorder %v316_v25, 4294967196 }
   0x5   :  { %vm117_vm3 = vcmp.lt.s32.totalorder %v113_v9, 32 }
   0x6   :  { %228 = vmatpush3.bf16.msra.mxu0 %v244_v2 }
   0x7   :  { %229 = vmatprep.subr.bf16.mxu0 %v260_v0 }
   0x9   :  { %v141_v17 = vld [vmem:[#allocation2] sm:$0xff]  ;;  %v142_v20 = vld [vmem:[#allocation2 + $0x8] sm:$0xff] }
   0xa   :  { %230 = vmatpush3.bf16.msra.mxu0 %v245_v3  ;;  %v149_v44 = vld [vmem:[#allocation3] sm:$0xff]  ;;  %v150_v48 = vld [vmem:[#allocation3 + $0x8] sm:$0xff] }
   0xb   :  { %231 = vmatprep.subr.bf16.mxu0 %v260_v0  ;;  %v128_v38 = vld [vmem:[#allocation4] sm:$0xff]  ;;  %v129_v53 = vld [vmem:[#allocation4 + $0x8] sm:$0xff] }
   0xe   :  { %232 = vmatpush3.bf16.msra.mxu0 %v246_v4 }
  0x11   :  { %234 = vmatmul.mubr.msk.bf16.vlgmr.msra.gmra.mrb[0].mxu0 %vm65_vm1, %v247_v5 }
  0xe4   :  { %v103_v10 = vpop.f32.mrb[0].mxu0 }
  0xe5   :  { %v118_v11 = vsel %vm117_vm3, %v103_v10, -1e+30  ;;  %v235_v12 = vpop.f32.mrb[1].mxu0 }
  0xe6   :  { %143 = vmax.xlane.f32.xlu0 %v118_v11  ;;  %v106_v13 = vpop.f32.mrb[2].mxu0 }
  0xe7   :  { %v236_v14 = vpop.f32.mrb[3].mxu0  ;;  %v119_v15 = vsel %vm117_vm3, %v106_v13, -1e+30 }
  0xea   :  { %145 = vmax.xlane.f32.xlu0 %v119_v15 }
 0x100   :  { %121 = vperm.xlu0 %242, %v308_v16  }
 0x173   :  { %v144_v18 = vpop.xlane.xlu0 %143 }
 0x174   :  { %v147_v19 = vmax.f32 %v141_v17, %v144_v18 }
 0x176   :  { %v151_v21 = vsub.f32 %v141_v17, %v147_v19  ;;  %183 = vst.msk [vmem:[#allocation2] sm:$0xff] %vm19_vm2, %v147_v19  ;;  %161 = vperm.xlu1 %241, %v147_v19  }
 0x177   :  { %v146_v22 = vpop.xlane.xlu0 %145 }
 0x178   :  { %v148_v23 = vmax.f32 %v142_v20, %v146_v22  ;;  %v153_v41 = vmul.f32 1.442695, %v151_v21 }
 0x17a   :  { %v152_v24 = vsub.f32 %v142_v20, %v148_v23  ;;  %184 = vst.msk [vmem:[#allocation2 + $0x8] sm:$0xff] %vm19_vm2, %v148_v23  ;;  %166 = vperm.xlu1 %241, %v148_v23  }
 0x17c   :  { %v155_v42 = vmul.f32 1.442695, %v152_v24 }
 0x17d   :  { %v188_v60 = vld [vmem:[#allocation2] sm:$0xff] }
 0x17e   :  { %124 = vperm.xlu1 %241, %v316_v25  }
 0x17f   :  { %v122_v26 = vpop.permute.xlu0 %121 }
 0x180   :  { %vm126_vm4 = vcmp.eq.s32.totalorder %v113_v9, %v122_v26 }
 0x181   :  { %v130_v27 = vsel %vm126_vm4, %v118_v11, 0.0  ;;  %v189_v2 = vld [vmem:[#allocation2 + $0x8] sm:$0xff] }
 0x182   :  { %132 = vadd.xlane.f32.xlu0 %v130_v27 }
 0x1f5   :  { %v162_v28 = vpop.permute.xlu1 %161 }
 0x1f6   :  { %v169_v29 = vsub.f32 %v118_v11, %v162_v28 }
 0x1f8   :  { %v171_v30 = vmul.f32 1.442695, %v169_v29 }
 0x1f9   :  { %v167_v31 = vpop.permute.xlu1 %166 }
 0x1fa   :  { %248 = vpow2.f32 %v171_v30  ;;  %v170_v32 = vsub.f32 %v119_v15, %v167_v31 }
 0x1fc   :  { %v173_v33 = vmul.f32 1.442695, %v170_v32 }
 0x1fd   :  { %v125_v35 = vpop.permute.xlu1 %124 }
 0x1fe   :  { %250 = vpow2.f32 %v173_v33  ;;  %vm127_vm5 = vcmp.eq.s32.totalorder %v113_v9, %v125_v35 }
 0x1ff   :  { %v131_v37 = vsel %vm127_vm5, %v119_v15, 0.0  ;;  %252 = vpow2.f32 %v153_v41 }
 0x200   :  { %254 = vpow2.f32 %v155_v42 }
 0x204   :  { %v249_v34 = vpop.eup %248 }
 0x205   :  { %175 = vadd.xlane.f32.xlu1 %v249_v34 }
 0x208   :  { %v251_v36 = vpop.eup %250 }
 0x209   :  { %177 = vadd.xlane.f32.xlu1 %v251_v36  ;;  %v253_v43 = vpop.eup %252 }
 0x20a   :  { %v157_v45 = vmul.f32 %v253_v43, %v149_v44  ;;  %v255_v46 = vpop.eup %254 }
 0x20b   :  { %v158_v50 = vmul.f32 %v255_v46, %v150_v48 }
 0x20d   :  { %134 = vadd.xlane.f32.xlu1 %v131_v37 }
 0x20f   :  { %v133_v39 = vpop.xlane.xlu0 %132 }
 0x210   :  { %v136_v40 = vadd.f32 %v133_v39, %v128_v38 }
 0x212   :  { %139 = vst.msk [vmem:[#allocation4] sm:$0xff] %vm19_vm2, %v136_v40 }
 0x219   :  { %v202_v63 = vld [vmem:[#allocation4] sm:$0xff] }
 0x292   :  { %v176_v47 = vpop.xlane.xlu1 %175 }
 0x293   :  { %v179_v49 = vadd.f32 %v176_v47, %v157_v45 }
 0x295   :  { %181 = vst.msk [vmem:[#allocation3] sm:$0xff] %vm19_vm2, %v179_v49 }
 0x296   :  { %v178_v51 = vpop.xlane.xlu1 %177 }
 0x297   :  { %v180_v52 = vadd.f32 %v178_v51, %v158_v50 }
 0x299   :  { %182 = vst.msk [vmem:[#allocation3 + $0x8] sm:$0xff] %vm19_vm2, %v180_v52 }
 0x29a   :  { %v135_v54 = vpop.xlane.xlu1 %134 }
 0x29b   :  { %v137_v55 = vadd.f32 %v135_v54, %v129_v53 }
 0x29c   :  { %v190_v56 = vld [vmem:[#allocation3] sm:$0xff] }
 0x29d   :  { %256 = vlog2.f32 %v190_v56  ;;  %140 = vst.msk [vmem:[#allocation4 + $0x8] sm:$0xff] %vm19_vm2, %v137_v55 }
 0x2a0   :  { %v191_v57 = vld [vmem:[#allocation3 + $0x8] sm:$0xff] }
 0x2a1   :  { %258 = vlog2.f32 %v191_v57 }
 0x2a4   :  { %v203_v5 = vld [vmem:[#allocation4 + $0x8] sm:$0xff] }
 0x2a7   :  { %v257_v58 = vpop.eup %256 }
 0x2a8   :  { %v193_v59 = vmul.f32 0.6931472, %v257_v58 }
 0x2aa   :  { %v196_v61 = vadd.f32 %v193_v59, %v188_v60 }
 0x2ab   :  { %v259_v62 = vpop.eup %258 }
 0x2ac   :  { %v204_v0 = vsub.f32 %v196_v61, %v202_v63  ;;  %v195_v1 = vmul.f32 0.6931472, %v259_v62 }
 0x2ae   :  { %v206_v3 = vsel %vm200_vm6, %v204_v0, 0.0  ;;  %v197_v4 = vadd.f32 %v195_v1, %v189_v2 }
 0x2af   :  { %208 = vst.msk [vmem:[%s336_s3] sm:$0xff] %vm19_vm2, %v206_v3 }
 0x2b0   :  { %v205_v6 = vsub.f32 %v197_v4, %v203_v5 }
 0x2b2   :  { %v207_v7 = vsel %vm201_vm7, %v205_v6, 0.0 }
 0x2b3   :  { %209 = vst.msk [vmem:[%s336_s3 + $0x8] sm:$0xff] %vm19_vm2, %v207_v7 }

</bundles_post_ra>
